<compile_context>
chip_gen: v6e
topology: v6e:2x2x1
jax: 0.10.0
libtpu: 0.0.40
codegen_flags: <defaults>
</compile_context>

<pallas_src>
import jax
import jax.numpy as jnp
from jax import lax
from jax.experimental import pallas as pl
from jax.experimental.pallas import tpu as pltpu


def _make_block_kernel(hw_pad, residual, tap_offsets):
    """Fused block: pw1(BN,ReLU6) -> dw3x3(BN,ReLU6) -> pw2(BN) [+ residual]."""

    def kernel(x_ref, w1_ref, s1_ref, wd_ref, s2_ref, m_ref, w2_ref, s3_ref,
               o_ref):
        x = x_ref[0]                                       # (c1, hw_pad)

        # --- pw1: 1x1 conv (BN scale folded into weight) + ReLU6 ------------
        y1 = jnp.dot(w1_ref[...], x.astype(w1_ref.dtype),
                     preferred_element_type=jnp.float32)
        y1 = jnp.clip(y1 + s1_ref[...], 0.0, 6.0)          # (c_mid, hw_pad) f32

        # --- depthwise 3x3, stride 1, pad 1 (BN folded) + ReLU6 -------------
        # out[p] = sum_t wd[:, t] * y1[p + off_t] * mask_t[p]
        m = m_ref[...]                                      # (9, hw_pad) f32
        wd = wd_ref[...]                                    # (c_mid, 9)  f32
        acc = jnp.zeros_like(y1)
        for t, s in enumerate(tap_offsets):
            # shifted[p] = y1[(p + s) mod hw_pad]; wrap-around is masked out.
            shifted = y1 if s == 0 else pltpu.roll(y1, shift=(-s) % hw_pad,
                                                   axis=1)
            acc = acc + shifted * m[t:t + 1, :] * wd[:, t:t + 1]
        y2 = jnp.clip(acc + s2_ref[...], 0.0, 6.0)          # (c_mid, hw_pad)

        # --- pw2: 1x1 conv (BN folded), no activation ------------------------
        y3 = jnp.dot(w2_ref[...], y2.astype(w2_ref.dtype),
                     preferred_element_type=jnp.float32)
        y3 = y3 + s3_ref[...]
        if residual:
            y3 = y3 + x.astype(jnp.float32)
        o_ref[0] = y3.astype(o_ref.dtype)

    return kernel


def mobilenetv3_block_forward(x_nchw, p, *, eps=1e-5,
                              compute_dtype=jnp.float32,
                              vmem_limit_bytes=48 * 1024 * 1024):
    """MobileNetV3_BLOCK forward (pw=True, k=3, stride=1, act='RE').

    x_nchw: (N, c1, H, W) float32.  p: dict of conv/BN parameters (see main).
    """
    N, c1, H, W = x_nchw.shape
    c_mid = p["pw1_w"].shape[0]
    c2 = p["pw2_w"].shape[0]
    residual = (c1 == c2)                       # stride == 1 here
    hw = H * W
    hw_pad = ((hw + 127) // 128) * 128          # lane-dense spatial axis

    # ---- fold BatchNorm (eval mode) into conv weights / per-channel shift --
    def fold(w, b, gamma, beta, mean, var):
        scale = gamma / jnp.sqrt(var + eps)
        w_f = w.reshape(w.shape[0], -1) * scale[:, None]
        shift = (b - mean) * scale + beta
        return w_f, shift.reshape(-1, 1).astype(jnp.float32)

    w1_f, sh1 = fold(p["pw1_w"], p["pw1_b"],
                     p["bn1_g"], p["bn1_b"], p["bn1_m"], p["bn1_v"])
    wd_f, sh2 = fold(p["dw_w"], p["dw_b"],
                     p["bn2_g"], p["bn2_b"], p["bn2_m"], p["bn2_v"])
    w2_f, sh3 = fold(p["pw2_w"], p["pw2_b"],
                     p["bn3_g"], p["bn3_b"], p["bn3_m"], p["bn3_v"])
    w1_f = w1_f.astype(compute_dtype)           # (c_mid, c1)   MXU operand
    w2_f = w2_f.astype(compute_dtype)           # (c2, c_mid)   MXU operand
    wd_f = wd_f.astype(jnp.float32)             # (c_mid, 9)    VPU operand

    # ---- NCHW-native layout: flatten spatial so H*W is the lane axis -------
    x_flat = x_nchw.reshape(N, c1, hw).astype(compute_dtype)
    if hw_pad != hw:
        x_flat = jnp.pad(x_flat, ((0, 0), (0, 0), (0, hw_pad - hw)))

    # ---- boundary masks + lane offsets for the 9 depthwise taps ------------
    pos = jnp.arange(hw_pad, dtype=jnp.int32)
    hh, ww = pos // W, pos % W
    masks, offsets = [], []
    for dh in (-1, 0, 1):
        for dw in (-1, 0, 1):
            valid = ((hh + dh >= 0) & (hh + dh < H) &
                     (ww + dw >= 0) & (ww + dw < W) & (pos < hw))
            masks.append(valid)
            offsets.append(dh * W + dw)
    masks = jnp.stack(masks, axis=0).astype(jnp.float32)    # (9, hw_pad)

    kernel = _make_block_kernel(hw_pad, residual, tuple(offsets))

    def weight_spec(shape):
        return pl.BlockSpec(shape, lambda n: (0, 0))

    out_flat = pl.pallas_call(
        kernel,
        out_shape=jax.ShapeDtypeStruct((N, c2, hw_pad), jnp.float32),
        grid=(N,),
        in_specs=[
            pl.BlockSpec((1, c1, hw_pad), lambda n: (n, 0, 0)),   # x
            weight_spec((c_mid, c1)),                             # w1 (folded)
            weight_spec((c_mid, 1)),                              # shift1
            weight_spec((c_mid, 9)),                              # dw weights
            weight_spec((c_mid, 1)),                              # shift2
            weight_spec((9, hw_pad)),                             # dw masks
            weight_spec((c2, c_mid)),                             # w2 (folded)
            weight_spec((c2, 1)),                                 # shift3
        ],
        out_specs=pl.BlockSpec((1, c2, hw_pad), lambda n: (n, 0, 0)),
        compiler_params=pltpu.CompilerParams(
            dimension_semantics=("parallel",),
            vmem_limit_bytes=vmem_limit_bytes),
    )(x_flat, w1_f, sh1, wd_f, sh2, masks, w2_f, sh3)

    return out_flat[:, :, :hw].reshape(N, c2, H, W)


def _reference_forward(x, p, eps=1e-5):
    """Pure-JAX reference of MobileNetV3_BLOCK (eval-mode BN)."""
    dn = ("NCHW", "OIHW", "NCHW")
    prec = lax.Precision.HIGHEST

    def bn(y, g, b, m, v):
        return ((y - m[None, :, None, None])
                / jnp.sqrt(v[None, :, None, None] + eps)
                * g[None, :, None, None] + b[None, :, None, None])

    # pw1 + BN + ReLU6
    y = lax.conv_general_dilated(x, p["pw1_w"], (1, 1), ((0, 0), (0, 0)),
                                 dimension_numbers=dn, precision=prec)
    y = y + p["pw1_b"][None, :, None, None]
    y = jnp.clip(bn(y, p["bn1_g"], p["bn1_b"], p["bn1_m"], p["bn1_v"]), 0., 6.)
    # depthwise 3x3 + BN + ReLU6
    c_mid = p["dw_w"].shape[0]
    y = lax.conv_general_dilated(y, p["dw_w"], (1, 1), ((1, 1), (1, 1)),
                                 dimension_numbers=dn,
                                 feature_group_count=c_mid, precision=prec)
    y = y + p["dw_b"][None, :, None, None]
    y = jnp.clip(bn(y, p["bn2_g"], p["bn2_b"], p["bn2_m"], p["bn2_v"]), 0., 6.)
    # pw2 + BN (no activation)
    y = lax.conv_general_dilated(y, p["pw2_w"], (1, 1), ((0, 0), (0, 0)),
                                 dimension_numbers=dn, precision=prec)
    y = y + p["pw2_b"][None, :, None, None]
    y = bn(y, p["bn3_g"], p["bn3_b"], p["bn3_m"], p["bn3_v"])
    if x.shape[1] == y.shape[1]:
        y = x + y
    return y


if __name__ == "__main__":
    key = jax.random.PRNGKey(0)
    # Default block config: pw=True, k=3, stride=1, act='RE', e=8 -> c_mid=8.
    # c1 == c2 and stride == 1 -> residual path is exercised.
    N, c1, c2, c_mid, H, W = 2, 4, 4, 8, 16, 16
    ks = jax.random.split(key, 24)

    def normal(i, shape, scale=1.0):
        return scale * jax.random.normal(ks[i], shape, dtype=jnp.float32)

    p = {
        "pw1_w": normal(0, (c_mid, c1, 1, 1), 0.3),
        "pw1_b": normal(1, (c_mid,), 0.1),
        "bn1_g": 1.0 + normal(2, (c_mid,), 0.1),
        "bn1_b": normal(3, (c_mid,), 0.1),
        "bn1_m": normal(4, (c_mid,), 0.1),
        "bn1_v": jnp.abs(normal(5, (c_mid,))) + 0.5,
        "dw_w": normal(6, (c_mid, 1, 3, 3), 0.3),
        "dw_b": normal(7, (c_mid,), 0.1),
        "bn2_g": 1.0 + normal(8, (c_mid,), 0.1),
        "bn2_b": normal(9, (c_mid,), 0.1),
        "bn2_m": normal(10, (c_mid,), 0.1),
        "bn2_v": jnp.abs(normal(11, (c_mid,))) + 0.5,
        "pw2_w": normal(12, (c2, c_mid, 1, 1), 0.3),
        "pw2_b": normal(13, (c2,), 0.1),
        "bn3_g": 1.0 + normal(14, (c2,), 0.1),
        "bn3_b": normal(15, (c2,), 0.1),
        "bn3_m": normal(16, (c2,), 0.1),
        "bn3_v": jnp.abs(normal(17, (c2,))) + 0.5,
    }
    x = normal(18, (N, c1, H, W))

    out = mobilenetv3_block_forward(x, p)
    out = jax.block_until_ready(out)

    ref = jax.block_until_ready(_reference_forward(x, p))

    assert out.shape == (N, c2, H, W)
    assert jnp.allclose(out, ref, atol=1e-2, rtol=1e-2), (
        "mismatch vs reference: max abs diff = "
        f"{float(jnp.max(jnp.abs(out - ref)))}")

    print("KERNEL_OK")
</pallas_src>

<mosaic_0001>
module attributes {stable_mosaic.version = 11 : i64} {
  func.func @kernel(%arg0: i32, %arg1: memref<1x4x256xf32, #tpu.memory_space<vmem>>, %arg2: memref<8x4xf32, #tpu.memory_space<vmem>>, %arg3: memref<8x1xf32, #tpu.memory_space<vmem>>, %arg4: memref<8x9xf32, #tpu.memory_space<vmem>>, %arg5: memref<8x1xf32, #tpu.memory_space<vmem>>, %arg6: memref<9x256xf32, #tpu.memory_space<vmem>>, %arg7: memref<4x8xf32, #tpu.memory_space<vmem>>, %arg8: memref<4x1xf32, #tpu.memory_space<vmem>>, %arg9: memref<1x4x256xf32, #tpu.memory_space<vmem>>) attributes {dimension_semantics = [#tpu.dimension_semantics<parallel>], iteration_bounds = array<i64: 2>, scalar_prefetch = 0 : i64, scratch_operands = 0 : i64, tpu.core_type = #tpu.core_type<tc>, window_params = [{transform_indices = @transform_0, window_bounds = array<i64: 1, 4, 256>}, {pipeline_mode = #tpu.pipeline_mode<synchronous>, transform_indices = @transform_1, window_bounds = array<i64: 8, 4>}, {pipeline_mode = #tpu.pipeline_mode<synchronous>, transform_indices = @transform_2, window_bounds = array<i64: 8, 1>}, {pipeline_mode = #tpu.pipeline_mode<synchronous>, transform_indices = @transform_3, window_bounds = array<i64: 8, 9>}, {pipeline_mode = #tpu.pipeline_mode<synchronous>, transform_indices = @transform_4, window_bounds = array<i64: 8, 1>}, {pipeline_mode = #tpu.pipeline_mode<synchronous>, transform_indices = @transform_5, window_bounds = array<i64: 9, 256>}, {pipeline_mode = #tpu.pipeline_mode<synchronous>, transform_indices = @transform_6, window_bounds = array<i64: 4, 8>}, {pipeline_mode = #tpu.pipeline_mode<synchronous>, transform_indices = @transform_7, window_bounds = array<i64: 4, 1>}, {transform_indices = @transform_8, window_bounds = array<i64: 1, 4, 256>}]} {
    %c0 = arith.constant 0 : index
    %c0_0 = arith.constant 0 : index
    %c0_1 = arith.constant 0 : index
    %0 = vector.load %arg1[%c0, %c0_0, %c0_1] : memref<1x4x256xf32, #tpu.memory_space<vmem>>, vector<1x4x256xf32>
    %1 = vector.shape_cast %0 : vector<1x4x256xf32> to vector<4x256xf32>
    %c0_2 = arith.constant 0 : index
    %c0_3 = arith.constant 0 : index
    %2 = vector.load %arg2[%c0_2, %c0_3] : memref<8x4xf32, #tpu.memory_space<vmem>>, vector<8x4xf32>
    %cst = arith.constant dense<0.000000e+00> : vector<8x256xf32>
    %3 = tpu.matmul %2, %1, %cst {dimension_numbers = #tpu.dot_dimension_numbers<[1], [0], [0], [1], [0, 0, 1, 1], [], []>} : vector<8x4xf32>, vector<4x256xf32>, vector<8x256xf32> -> vector<8x256xf32>
    %c0_4 = arith.constant 0 : index
    %c0_5 = arith.constant 0 : index
    %4 = vector.load %arg3[%c0_4, %c0_5] : memref<8x1xf32, #tpu.memory_space<vmem>>, vector<8x1xf32>
    %5 = vector.broadcast %4 : vector<8x1xf32> to vector<8x256xf32>
    %6 = arith.addf %3, %5 : vector<8x256xf32>
    %cst_6 = arith.constant 0.000000e+00 : f32
    %cst_7 = arith.constant 6.000000e+00 : f32
    %7 = vector.broadcast %cst_6 : f32 to vector<8x256xf32>
    %8 = arith.maximumf %7, %6 : vector<8x256xf32>
    %9 = vector.broadcast %cst_7 : f32 to vector<8x256xf32>
    %10 = arith.minimumf %9, %8 : vector<8x256xf32>
    %c0_8 = arith.constant 0 : index
    %c0_9 = arith.constant 0 : index
    %11 = vector.load %arg6[%c0_8, %c0_9] : memref<9x256xf32, #tpu.memory_space<vmem>>, vector<9x256xf32>
    %c0_10 = arith.constant 0 : index
    %c0_11 = arith.constant 0 : index
    %12 = vector.load %arg4[%c0_10, %c0_11] : memref<8x9xf32, #tpu.memory_space<vmem>>, vector<8x9xf32>
    %cst_12 = arith.constant 0.000000e+00 : f32
    %13 = vector.broadcast %cst_12 : f32 to vector<8x256xf32>
    %c17_i32 = arith.constant 17 : i32
    %14 = tpu.dynamic_rotate %10 by %c17_i32 dim 1 : vector<8x256xf32>, i32 -> vector<8x256xf32>
    %15 = vector.extract_strided_slice %11 {offsets = [0, 0], sizes = [1, 256], strides = [1, 1]} : vector<9x256xf32> to vector<1x256xf32>
    %16 = vector.broadcast %15 : vector<1x256xf32> to vector<8x256xf32>
    %17 = arith.mulf %14, %16 : vector<8x256xf32>
    %18 = vector.extract_strided_slice %12 {offsets = [0, 0], sizes = [8, 1], strides = [1, 1]} : vector<8x9xf32> to vector<8x1xf32>
    %19 = vector.broadcast %18 : vector<8x1xf32> to vector<8x256xf32>
    %20 = arith.mulf %17, %19 : vector<8x256xf32>
    %21 = arith.addf %13, %20 : vector<8x256xf32>
    %c16_i32 = arith.constant 16 : i32
    %22 = tpu.dynamic_rotate %10 by %c16_i32 dim 1 : vector<8x256xf32>, i32 -> vector<8x256xf32>
    %23 = vector.extract_strided_slice %11 {offsets = [1, 0], sizes = [1, 256], strides = [1, 1]} : vector<9x256xf32> to vector<1x256xf32>
    %24 = vector.broadcast %23 : vector<1x256xf32> to vector<8x256xf32>
    %25 = arith.mulf %22, %24 : vector<8x256xf32>
    %26 = vector.extract_strided_slice %12 {offsets = [0, 1], sizes = [8, 1], strides = [1, 1]} : vector<8x9xf32> to vector<8x1xf32>
    %27 = vector.broadcast %26 : vector<8x1xf32> to vector<8x256xf32>
    %28 = arith.mulf %25, %27 : vector<8x256xf32>
    %29 = arith.addf %21, %28 : vector<8x256xf32>
    %c15_i32 = arith.constant 15 : i32
    %30 = tpu.dynamic_rotate %10 by %c15_i32 dim 1 : vector<8x256xf32>, i32 -> vector<8x256xf32>
    %31 = vector.extract_strided_slice %11 {offsets = [2, 0], sizes = [1, 256], strides = [1, 1]} : vector<9x256xf32> to vector<1x256xf32>
    %32 = vector.broadcast %31 : vector<1x256xf32> to vector<8x256xf32>
    %33 = arith.mulf %30, %32 : vector<8x256xf32>
    %34 = vector.extract_strided_slice %12 {offsets = [0, 2], sizes = [8, 1], strides = [1, 1]} : vector<8x9xf32> to vector<8x1xf32>
    %35 = vector.broadcast %34 : vector<8x1xf32> to vector<8x256xf32>
    %36 = arith.mulf %33, %35 : vector<8x256xf32>
    %37 = arith.addf %29, %36 : vector<8x256xf32>
    %c1_i32 = arith.constant 1 : i32
    %38 = tpu.dynamic_rotate %10 by %c1_i32 dim 1 : vector<8x256xf32>, i32 -> vector<8x256xf32>
    %39 = vector.extract_strided_slice %11 {offsets = [3, 0], sizes = [1, 256], strides = [1, 1]} : vector<9x256xf32> to vector<1x256xf32>
    %40 = vector.broadcast %39 : vector<1x256xf32> to vector<8x256xf32>
    %41 = arith.mulf %38, %40 : vector<8x256xf32>
    %42 = vector.extract_strided_slice %12 {offsets = [0, 3], sizes = [8, 1], strides = [1, 1]} : vector<8x9xf32> to vector<8x1xf32>
    %43 = vector.broadcast %42 : vector<8x1xf32> to vector<8x256xf32>
    %44 = arith.mulf %41, %43 : vector<8x256xf32>
    %45 = arith.addf %37, %44 : vector<8x256xf32>
    %46 = vector.extract_strided_slice %11 {offsets = [4, 0], sizes = [1, 256], strides = [1, 1]} : vector<9x256xf32> to vector<1x256xf32>
    %47 = vector.broadcast %46 : vector<1x256xf32> to vector<8x256xf32>
    %48 = arith.mulf %10, %47 : vector<8x256xf32>
    %49 = vector.extract_strided_slice %12 {offsets = [0, 4], sizes = [8, 1], strides = [1, 1]} : vector<8x9xf32> to vector<8x1xf32>
    %50 = vector.broadcast %49 : vector<8x1xf32> to vector<8x256xf32>
    %51 = arith.mulf %48, %50 : vector<8x256xf32>
    %52 = arith.addf %45, %51 : vector<8x256xf32>
    %c255_i32 = arith.constant 255 : i32
    %53 = tpu.dynamic_rotate %10 by %c255_i32 dim 1 : vector<8x256xf32>, i32 -> vector<8x256xf32>
    %54 = vector.extract_strided_slice %11 {offsets = [5, 0], sizes = [1, 256], strides = [1, 1]} : vector<9x256xf32> to vector<1x256xf32>
    %55 = vector.broadcast %54 : vector<1x256xf32> to vector<8x256xf32>
    %56 = arith.mulf %53, %55 : vector<8x256xf32>
    %57 = vector.extract_strided_slice %12 {offsets = [0, 5], sizes = [8, 1], strides = [1, 1]} : vector<8x9xf32> to vector<8x1xf32>
    %58 = vector.broadcast %57 : vector<8x1xf32> to vector<8x256xf32>
    %59 = arith.mulf %56, %58 : vector<8x256xf32>
    %60 = arith.addf %52, %59 : vector<8x256xf32>
    %c241_i32 = arith.constant 241 : i32
    %61 = tpu.dynamic_rotate %10 by %c241_i32 dim 1 : vector<8x256xf32>, i32 -> vector<8x256xf32>
    %62 = vector.extract_strided_slice %11 {offsets = [6, 0], sizes = [1, 256], strides = [1, 1]} : vector<9x256xf32> to vector<1x256xf32>
    %63 = vector.broadcast %62 : vector<1x256xf32> to vector<8x256xf32>
    %64 = arith.mulf %61, %63 : vector<8x256xf32>
    %65 = vector.extract_strided_slice %12 {offsets = [0, 6], sizes = [8, 1], strides = [1, 1]} : vector<8x9xf32> to vector<8x1xf32>
    %66 = vector.broadcast %65 : vector<8x1xf32> to vector<8x256xf32>
    %67 = arith.mulf %64, %66 : vector<8x256xf32>
    %68 = arith.addf %60, %67 : vector<8x256xf32>
    %c240_i32 = arith.constant 240 : i32
    %69 = tpu.dynamic_rotate %10 by %c240_i32 dim 1 : vector<8x256xf32>, i32 -> vector<8x256xf32>
    %70 = vector.extract_strided_slice %11 {offsets = [7, 0], sizes = [1, 256], strides = [1, 1]} : vector<9x256xf32> to vector<1x256xf32>
    %71 = vector.broadcast %70 : vector<1x256xf32> to vector<8x256xf32>
    %72 = arith.mulf %69, %71 : vector<8x256xf32>
    %73 = vector.extract_strided_slice %12 {offsets = [0, 7], sizes = [8, 1], strides = [1, 1]} : vector<8x9xf32> to vector<8x1xf32>
    %74 = vector.broadcast %73 : vector<8x1xf32> to vector<8x256xf32>
    %75 = arith.mulf %72, %74 : vector<8x256xf32>
    %76 = arith.addf %68, %75 : vector<8x256xf32>
    %c239_i32 = arith.constant 239 : i32
    %77 = tpu.dynamic_rotate %10 by %c239_i32 dim 1 : vector<8x256xf32>, i32 -> vector<8x256xf32>
    %78 = vector.extract_strided_slice %11 {offsets = [8, 0], sizes = [1, 256], strides = [1, 1]} : vector<9x256xf32> to vector<1x256xf32>
    %79 = vector.broadcast %78 : vector<1x256xf32> to vector<8x256xf32>
    %80 = arith.mulf %77, %79 : vector<8x256xf32>
    %81 = vector.extract_strided_slice %12 {offsets = [0, 8], sizes = [8, 1], strides = [1, 1]} : vector<8x9xf32> to vector<8x1xf32>
    %82 = vector.broadcast %81 : vector<8x1xf32> to vector<8x256xf32>
    %83 = arith.mulf %80, %82 : vector<8x256xf32>
    %84 = arith.addf %76, %83 : vector<8x256xf32>
    %c0_13 = arith.constant 0 : index
    %c0_14 = arith.constant 0 : index
    %85 = vector.load %arg5[%c0_13, %c0_14] : memref<8x1xf32, #tpu.memory_space<vmem>>, vector<8x1xf32>
    %86 = vector.broadcast %85 : vector<8x1xf32> to vector<8x256xf32>
    %87 = arith.addf %84, %86 : vector<8x256xf32>
    %cst_15 = arith.constant 0.000000e+00 : f32
    %cst_16 = arith.constant 6.000000e+00 : f32
    %88 = vector.broadcast %cst_15 : f32 to vector<8x256xf32>
    %89 = arith.maximumf %88, %87 : vector<8x256xf32>
    %90 = vector.broadcast %cst_16 : f32 to vector<8x256xf32>
    %91 = arith.minimumf %90, %89 : vector<8x256xf32>
    %c0_17 = arith.constant 0 : index
    %c0_18 = arith.constant 0 : index
    %92 = vector.load %arg7[%c0_17, %c0_18] : memref<4x8xf32, #tpu.memory_space<vmem>>, vector<4x8xf32>
    %cst_19 = arith.constant dense<0.000000e+00> : vector<4x256xf32>
    %93 = tpu.matmul %92, %91, %cst_19 {dimension_numbers = #tpu.dot_dimension_numbers<[1], [0], [0], [1], [0, 0, 1, 1], [], []>} : vector<4x8xf32>, vector<8x256xf32>, vector<4x256xf32> -> vector<4x256xf32>
    %c0_20 = arith.constant 0 : index
    %c0_21 = arith.constant 0 : index
    %94 = vector.load %arg8[%c0_20, %c0_21] : memref<4x1xf32, #tpu.memory_space<vmem>>, vector<4x1xf32>
    %95 = vector.broadcast %94 : vector<4x1xf32> to vector<4x256xf32>
    %96 = arith.addf %93, %95 : vector<4x256xf32>
    %97 = arith.addf %96, %1 : vector<4x256xf32>
    %c0_22 = arith.constant 0 : index
    %c0_23 = arith.constant 0 : index
    %c0_24 = arith.constant 0 : index
    %98 = vector.load %arg9[%c0_22, %c0_23, %c0_24] : memref<1x4x256xf32, #tpu.memory_space<vmem>>, vector<1x4x256xf32>
    %99 = vector.shape_cast %98 : vector<1x4x256xf32> to vector<4x256xf32>
    %100 = vector.shape_cast %97 : vector<4x256xf32> to vector<1x4x256xf32>
    tpu.vector_store %arg9[%c0_22, %c0_23, %c0_24], %100 {strides = array<i32>} : memref<1x4x256xf32, #tpu.memory_space<vmem>>, vector<1x4x256xf32>,
    return
  }
  func.func @transform_0(%arg0: i32) -> (i32, i32, i32) {
    %c0_i32 = arith.constant 0 : i32
    %c0_i32_0 = arith.constant 0 : i32
    %c0_i32_1 = arith.constant 0 : i32
    return %arg0, %c0_i32, %c0_i32_0 : i32, i32, i32
  }
  func.func @transform_1(%arg0: i32) -> (i32, i32) {
    %c0_i32 = arith.constant 0 : i32
    %c0_i32_0 = arith.constant 0 : i32
    %c0_i32_1 = arith.constant 0 : i32
    return %c0_i32, %c0_i32_0 : i32, i32
  }
  func.func @transform_2(%arg0: i32) -> (i32, i32) {
    %c0_i32 = arith.constant 0 : i32
    %c0_i32_0 = arith.constant 0 : i32
    %c0_i32_1 = arith.constant 0 : i32
    return %c0_i32, %c0_i32_0 : i32, i32
  }
  func.func @transform_3(%arg0: i32) -> (i32, i32) {
    %c0_i32 = arith.constant 0 : i32
    %c0_i32_0 = arith.constant 0 : i32
    %c0_i32_1 = arith.constant 0 : i32
    return %c0_i32, %c0_i32_0 : i32, i32
  }
  func.func @transform_4(%arg0: i32) -> (i32, i32) {
    %c0_i32 = arith.constant 0 : i32
    %c0_i32_0 = arith.constant 0 : i32
    %c0_i32_1 = arith.constant 0 : i32
    return %c0_i32, %c0_i32_0 : i32, i32
  }
  func.func @transform_5(%arg0: i32) -> (i32, i32) {
    %c0_i32 = arith.constant 0 : i32
    %c0_i32_0 = arith.constant 0 : i32
    %c0_i32_1 = arith.constant 0 : i32
    return %c0_i32, %c0_i32_0 : i32, i32
  }
  func.func @transform_6(%arg0: i32) -> (i32, i32) {
    %c0_i32 = arith.constant 0 : i32
    %c0_i32_0 = arith.constant 0 : i32
    %c0_i32_1 = arith.constant 0 : i32
    return %c0_i32, %c0_i32_0 : i32, i32
  }
  func.func @transform_7(%arg0: i32) -> (i32, i32) {
    %c0_i32 = arith.constant 0 : i32
    %c0_i32_0 = arith.constant 0 : i32
    %c0_i32_1 = arith.constant 0 : i32
    return %c0_i32, %c0_i32_0 : i32, i32
  }
  func.func @transform_8(%arg0: i32) -> (i32, i32, i32) {
    %c0_i32 = arith.constant 0 : i32
    %c0_i32_0 = arith.constant 0 : i32
    %c0_i32_1 = arith.constant 0 : i32
    return %arg0, %c0_i32, %c0_i32_0 : i32, i32, i32
  }
}

</mosaic_0001>

<bundles_post_ra>
// kernel: tpu_custom_call.1
= control target key start
LH: loop header
LB: loop body
LE: loop exit
PB: predicated region body
PF: predicated region fallthrough
CT: control target
= control target key end

     0   :  { %13 = vsyncpa [#allocation3], 0  ;;  %s1388_s0 = inlined_call_operand.hbm [shape: f32[2,4,256], index: 0, kind: input, shape index: {}]   ;;  %s1389_s1 = inlined_call_operand.vmem [shape: f32[8,4], index: 1, kind: input, shape index: {}]   ;;  %s1390_s2 = inlined_call_operand.vmem [shape: f32[8,1], index: 2, kind: input, shape index: {}]   ;;  %s1391_s3 = inlined_call_operand.vmem [shape: f32[8,9], index: 3, kind: input, shape index: {}]   ;;  %s1392_s4 = inlined_call_operand.vmem [shape: f32[8,1], index: 4, kind: input, shape index: {}]   ;;  %s1393_s5 = inlined_call_operand.vmem [shape: f32[9,256], index: 5, kind: input, shape index: {}]   ;;  %s1394_s6 = inlined_call_operand.vmem [shape: f32[4,8], index: 6, kind: input, shape index: {}]   ;;  %s1395_s7 = inlined_call_operand.vmem [shape: f32[4,1], index: 7, kind: input, shape index: {}]   ;;  %s1396_s8 = inlined_call_operand.hbm [shape: f32[2,4,256], index: 8, kind: output, shape index: {}]  }
   0x1   :  { %15 = vsyncpa [#allocation3 + $0x1], 0 }
   0x2   :  { %16 = vsyncpa [#allocation4], 0 }
   0x3   :  { %18 = vsyncpa [#allocation4 + $0x1], 0  ;;  %s1086_s27 = smov 0   ;;  %s1088_s28 = smov 0  }
   0x4   :  { %s1090_s29 = smov 0   ;;  %s1092_s30 = smov 0  }
   0x5 LB: > { %s1107_s9 = sadd.s32 4294967295, %s1019_s30   ;;  %s829_s10 = sadd.s32 4294967294, %s1019_s30   ;;  %s1019_s30 = sphi %s1092_s30, %s1415_s30   ;;  %s1015_s29 = sphi %s1090_s29, %s1414_s29   ;;  %s1011_s28 = sphi %s1088_s28, %s1413_s28   ;;  %s1007_s27 = sphi %s1086_s27, %s1412_s27  }
   0x6   : > { %s1111_s11 = sadd.s32 1, %s1019_s30   ;;  %s31_s12 = sadd.s32 1, %s1015_s29 }
   0x7   : > { %s28_s13 = ssub.s32 %s1019_s30, %s1111_s11  ;;  %p38_p0 = scmp.ne.s32.totalorder %s1015_s29, %s1011_s28 }
   0x8   : > { %p29_p1 = scmp.eq.s32.totalorder %s28_s13, 0  ;;  %p39_p2 = scmp.eq.s32.totalorder %s1019_s30, 0 }
   0x9   : > { %p44_p3 = scmp.ne.s32.totalorder %s1011_s28, %s1007_s27  ;;  %p45_p4 = scmp.eq.s32.totalorder %s1107_s9, 0 }
   0xa   : > { %s1123_s14 = scalar_select %p29_p1, %s1015_s29, %s31_s12  }
   0xb   : > { %p1125_p5 = por %p39_p2, %p38_p0  ;;  %p1129_p6 = por %p45_p4, %p44_p3 }
   0xc   : > { %1399 = sst [smem:[#allocation8_spill]] %s1123_s14  ;;  %p215_p7 = scmp.eq.s32.totalorder %s1107_s9, 1 }
   0xd   : > { %s1401_s16 = scalar_select %p1129_p6, 1, 0 }
   0xe   : > { %p221_p8 = scmp.eq.s32.totalorder %s829_s10, 1  ;;  %p863_p10 = scmp.lt.s32.totalorder %s1019_s30, 2 }
   0xf   : > { %p1136_p11 = por %p215_p7, %p38_p0  ;;  %s262_s19 = sand.u32 1, %s1015_s29  }
  0x10   : > { %p1140_p12 = por %p221_p8, %p44_p3  ;;  %s849_s20 = sshll.u32 %s1019_s30, 7 }
  0x11   : > { %s1402_s17 = scalar_select %p1136_p11, 1, 0 }
  0x12   : > { %s1403_s18 = scalar_select %p1140_p12, 1, 0 }
  0x13   : > { %s832_s21 = sshll.u32 %s262_s19, 3  ;;  %s1149_s24 = scalar_lea.hbm %s1388_s0, %s849_s20 }
  0x14   : > { %s266_s25 = scalar_lea.vmem [#allocation2], %s832_s21  ;;  %p1153_p13 = pnand %p863_p10, %p1125_p5 }
  0x15   : > { %s274_s26 = sshll.u32 %s266_s25, 4  ;;  %s263_s12 = scalar_lea.sflag [#allocation3], %s262_s19  ;;  %s1157_s26 = int_to_ptr.vmem [resolvable:$true] %s274_s26 }
  0x16   : > { %s927_s13 = scalar_lea.hbm %s1149_s24, 128  ;;  %p929_p3 = pneg %p1153_p13 }
  0x17   : > { %p928_p2 = scmp.ne.s32.totalorder %s1149_s24, %s927_s13  ;;  %s932_s15 = scalar_lea.hbm %s1388_s0, 256 }
  0x18   : > { %p933_p5 = scmp.lt.s32.totalorder %s1149_s24, %s1388_s0  ;;  %p934_p8 = scmp.lt.s32.totalorder %s932_s15, %s927_s13 }
  0x19   : > { %p930_p4 = pnand %p929_p3, %p928_p2 }
  0x1a   : > { %p935_p10 = por %p934_p8, %p933_p5 }
  0x1b   : > { %p931_p7 = pneg %p930_p4 }
  0x1d   : > { %p936_p9 = pnand %p935_p10, %p931_p7 }
  0x1f   : > { %939 = shalt.err (!%p936_p9)
}
  0x20   : > { %s940_s19 = scalar_lea.vmem %s1157_s26, 128  ;;  %s1021_s25 = smov [#allocation2]  }
  0x21   : > { %p941_p0 = scmp.ne.s32.totalorder %s1157_s26, %s940_s19  ;;  %s945_s14 = sshll.u32 %s1021_s25, 4  ;;  %s946_s14 = int_to_ptr.vmem [resolvable:$false] %s945_s14 }
  0x22   : > { %s947_s20 = scalar_lea.vmem %s946_s14, 256  ;;  %p948_p4 = scmp.lt.s32.totalorder %s1157_s26, %s946_s14 }
  0x23   : > { %p943_p1 = pnand %p941_p0, %p929_p3  ;;  %p949_p12 = scmp.lt.s32.totalorder %s947_s20, %s940_s19 }
  0x25   : > { %p944_p2 = pneg %p943_p1  ;;  %p950_p11 = por %p949_p12, %p948_p4 }
  0x27   : > { %p951_p6 = pnand %p950_p11, %p944_p2 }
  0x29   : > { %954 = shalt.err (!%p951_p6)
}
  0x2a   : > { %858 = dma.hbm_to_vmem [thread:$0]  (!%p1153_p13), %s1149_s24, 128, %s1157_s26, %s263_s12  }
  0x2b   : > { %p1405_p9 = scmp.lt.s32.totalorder %s1019_s30, 3  ;;  %p1406_p7 = scmp.ge.s32.totalorder %s1019_s30, 1 }
  0x2d   : > { %p280_p0 = pnand %p1406_p7, %p1405_p9 }
  0x2e   : > { %s1184_s13 = sand.u32 (!%p280_p0), 1, %s1011_s28   ;;  %p1407_p6 = scmp.ne.s32.totalorder (!%p280_p0), %s1401_s16, 0 }
  0x2f   : > { %283 = sbr.rel (%p280_p0) target bundleno = 642 (0x282), region = 52  ;;  %s836_s14 = sshll.u32 (!%p280_p0), %s1184_s13, 3 }
  0x30   : > { %s286_s21 = scalar_lea.sflag (!%p280_p0), [#allocation3], %s1184_s13  ;;  %s289_s10 = scalar_lea.vmem (!%p280_p0), [#allocation2], %s836_s14 }
  0x34   : > { %998 = dma.done.wait (%p1407_p6), %s286_s21, 128  }
  0x35   : > { %1000 = vsyncadd (%p1407_p6), %s286_s21, 4294967168  ;;  %v1022_v0 = vmov 0.0   ;;  %v1023_v1 = vmov 0   ;;  %v1024_v2 = vmov 1   ;;  %v1195_v3 = vld [vmem:[%s289_s10] sm:$0xff]  ;;  %vm336_vm0 = vcmask 1043456  }
  0x36   : > { %405 = vmatprep.mubr.f32.mxu0 %v1022_v0  ;;  %915 = vset.pattern.permute.xlu0 %v1023_v1  ;;  %v324_v4 = vld [vmem:[%s1390_s2] sm:$0xff]  ;;  %v1202_v5 = vcombine.high %v1195_v3, %v1195_v3  ;;  %vm332_vm1 = vcmask 31744   ;;  %v1025_v8 = vmov 2   ;;  %v1026_v9 = vmov 3   ;;  %s1032_s23 = smov 15   ;;  %s1033_s19 = smov 17  }
  0x37   : > { %916 = vset.pattern.permute.xlu1 %v1024_v2  ;;  %729 = vmatprep.mubr.f32.mxu1 %v1022_v0  ;;  %v420_v6 = vld [vmem:[%s1391_s3] sm:$0xff]  ;;  %v1027_v10 = vmov 5   ;;  %v1028_v11 = vmov 4   ;;  %v1029_v12 = vmov 6   ;;  %v1030_v13 = vmov 7   ;;  %s1034_s25 = smov 113  }
  0x38   : > { %327 = vperm.xlu0 %915, %v324_v4   ;;  %v323_v7 = vld [vmem:[%s1389_s1] sm:$0xff]  ;;  %467 = vperm.xlu1 %916, %v420_v6   ;;  %v1031_v14 = vmov 8   ;;  %s1035_s20 = smov 16   ;;  %s1036_s21 = smov 1   ;;  %v425_v38 = vlaneseq  ;;  %v1272_v49 = vld [vmem:[%s1393_s5 + $0x8] sm:$0xff]  ;;  %vm661_vm10 = vcmask 64512  }
  0x39   : > { %838 = vmatprep.subr.msk.mxu0 %vm336_vm0, %v1202_v5  ;;  %s1037_s10 = smov 127   ;;  %s1038_s24 = smov 112   ;;  %v642_v24 = vld [vmem:[%s1392_s4] sm:$0xff] }
  0x3a   : > { %839 = vmatpush1.msk.msra.mxu0 %vm336_vm0, %v1195_v3  ;;  %s1039_s12 = smov 111   ;;  %v655_v25 = vld [vmem:[%s1395_s7] sm:$0xf]  ;;  %v1254_v41 = vshrl.u32 %v425_v38, 7  ;;  %v1256_v42 = vand.u32 127, %v425_v38  ;;  %s850_s15 = sshll.u32 %s1107_s9, 7 }
  0x3b   : > { %840 = vmatmul.mubr.msk.f32.vlgmr.msra.gmra.mxu0 %vm332_vm1, %v323_v7  ;;  %v1267_v48 = vld [vmem:[%s1393_s5] sm:$0xff]  ;;  %s321_s22 = scalar_lea.vmem [#allocation5], %s836_s14  ;;  %p1408_p12 = scmp.ne.s32.totalorder %s1402_s17, 0 }
  0x3c   : > { %442 = vperm.xlu0 %915, %v420_v6   ;;  %917 = vset.pattern.permute.xlu1 %v1025_v8  ;;  %v432_v43 = vsub.s32 0, %v1254_v41  ;;  %v458_v44 = vsub.s32 1, %v1254_v41  ;;  %v483_v46 = vsub.s32 2, %v1254_v41  ;;  %vm453_vm2 = vcmp.lt.s32.totalorder %v1256_v42, 16  ;;  %s1040_s9 = smov [#allocation5]  }
  0x3d   : > { %492 = vperm.xlu1 %917, %v420_v6   ;;  %v526_v50 = vsub.s32 4, %v1254_v41  ;;  %vm427_vm3 = vcmp.lt.s32.totalorder %v1256_v42, 17  ;;  %vm478_vm4 = vcmp.lt.s32.totalorder %v1256_v42, 15  ;;  %v508_v62 = vsub.s32 3, %v1254_v41  ;;  %s959_s14 = sshll.u32 %s1040_s9, 4  ;;  %s960_s14 = int_to_ptr.vmem [resolvable:$false] %s959_s14 }
  0x3e   : > { %v433_v51 = vrot.slane %v1267_v48, %v432_v43  ;;  %v437_v52 = vrot.slane %v1272_v49, %v432_v43  ;;  %v459_v53 = vrot.slane %v1267_v48, %v458_v44  ;;  %v463_v54 = vrot.slane %v1272_v49, %v458_v44 }
  0x3f   : > { %v484_v58 = vrot.slane %v1267_v48, %v483_v46  ;;  %v488_v61 = vrot.slane %v1272_v49, %v483_v46  ;;  %v527_v63 = vrot.slane %v1267_v48, %v526_v50  ;;  %vm503_vm5 = vcmp.lt.s32.totalorder %v1256_v42, 1 }
  0x40   : > { %918 = vset.pattern.permute.xlu0 %v1026_v9  ;;  %vm546_vm6 = vcmp.lt.s32.totalorder %v1256_v42, 127  ;;  %vm571_vm7 = vcmp.lt.s32.totalorder %v1256_v42, 113  ;;  %vm596_vm8 = vcmp.lt.s32.totalorder %v1256_v42, 112  ;;  %vm621_vm9 = vcmp.lt.s32.totalorder %v1256_v42, 111 }
  0x41   : > { %517 = vperm.xlu0 %918, %v420_v6   ;;  %920 = vset.pattern.permute.xlu1 %v1027_v10 }
  0x42   : > { %560 = vperm.xlu1 %920, %v420_v6  }
  0x45   : > { %919 = vset.pattern.permute.xlu0 %v1028_v11  ;;  %v509_v11 = vrot.slane %v1267_v48, %v508_v62 }
  0x46   : > { %535 = vperm.xlu0 %919, %v420_v6   ;;  %921 = vset.pattern.permute.xlu1 %v1029_v12  ;;  %v513_v12 = vrot.slane %v1272_v49, %v508_v62 }
  0x47   : > { %585 = vperm.xlu1 %921, %v420_v6  }
  0x4a   : > { %922 = vset.pattern.permute.xlu0 %v1030_v13  ;;  %v531_v13 = vrot.slane %v1272_v49, %v526_v50  ;;  %v601_v50 = vsub.s32 7, %v1254_v41 }
  0x4b   : > { %610 = vperm.xlu0 %922, %v420_v6   ;;  %925 = vset.pattern.permute.xlu1 %v1023_v1 }
  0x4f   : > { %923 = vset.pattern.permute.xlu0 %v1031_v14  ;;  %v551_v14 = vsub.s32 5, %v1254_v41 }
  0xb3   : > { %v328_v15 = vpop.permute.xlu0 %327  ;;  %v468_v26 = vpop.permute.xlu1 %467 }
  0xb7   : > { %v443_v27 = vpop.permute.xlu0 %442 }
  0xb8   : > { %v1240_v28 = vpop.permute.xlu1 %492 }
  0xbc   : > { %v1242_v29 = vpop.permute.xlu0 %517 }
  0xbd   : > { %v1244_v30 = vpop.permute.xlu1 %560 }
  0xc1   : > { %v1246_v31 = vpop.permute.xlu0 %535 }
  0xc2   : > { %v1248_v32 = vpop.permute.xlu1 %585 }
  0xc6   : > { %v1250_v33 = vpop.permute.xlu0 %610 }
  0xfb   : > { %v407_v16 = vpop.f32.mrf.mxu0 }
  0xfc   : > { %v408_v17 = vadd.f32 %v407_v16, %v328_v15 }
  0xfd   : > { %v409_v18 = vpop.f32.mrf.mxu0 }
  0xfe   : > { %v412_v19 = vmax.f32 %v408_v17, 0.0  ;;  %v410_v21 = vadd.f32 %v409_v18, %v328_v15 }
 0x100   : > { %v1213_v20 = vmin.f32 %v412_v19, 6.0  ;;  %v413_v22 = vmax.f32 %v410_v21, 0.0  ;;  %v576_v19 = vsub.s32 6, %v1254_v41 }
 0x102   : > { %474 = vrot.lane.b32.xlu0 %v1213_v20, %s1032_s23  ;;  %421 = vrot.lane.b32.xlu1 %v1213_v20, %s1033_s19  ;;  %v1219_v23 = vmin.f32 %v413_v22, 6.0  ;;  %v532_v15 = vmul.f32 %v527_v63, %v1213_v20 }
 0x106   : > { %567 = vrot.lane.b32.xlu0 %v1213_v20, %s1034_s25  ;;  %449 = vrot.lane.b32.xlu1 %v1213_v20, %s1035_s20 }
 0x10a   : > { %423 = vrot.lane.b32.xlu0 %v1219_v23, %s1033_s19  ;;  %499 = vrot.lane.b32.xlu1 %v1213_v20, %s1036_s21 }
 0x10e   : > { %451 = vrot.lane.b32.xlu0 %v1219_v23, %s1035_s20  ;;  %542 = vrot.lane.b32.xlu1 %v1213_v20, %s1037_s10  ;;  %s757_s20 = scalar_lea.hbm %s1396_s8, %s850_s15 }
 0x112   : > { %544 = vrot.lane.b32.xlu0 %v1219_v23, %s1037_s10  ;;  %592 = vrot.lane.b32.xlu1 %v1213_v20, %s1038_s24 }
 0x116   : > { %476 = vrot.lane.b32.xlu1 %v1219_v23, %s1032_s23  ;;  %635 = vperm.xlu0 %923, %v420_v6   ;;  %s759_s23 = sshll.u32 %s321_s22, 4  ;;  %s760_s23 = int_to_ptr.vmem [resolvable:$true] %s759_s23 }
 0x117   : > { %s955_s10 = scalar_lea.vmem %s760_s23, 128  ;;  %p962_p3 = scmp.lt.s32.totalorder %s760_s23, %s960_s14 }
 0x118   : > { %p956_p11 = scmp.ne.s32.totalorder %s760_s23, %s955_s10 }
 0x11a   : > { %501 = vrot.lane.b32.xlu1 %v1219_v23, %s1036_s21  ;;  %924 = vset.pattern.permute.xlu0 %v1023_v1  ;;  %s745_s21 = scalar_lea.sflag [#allocation4], %s1184_s13  ;;  %p957_p13 = pnand %p956_p11, %p1408_p12 }
 0x11b   : > { %645 = vperm.xlu0 %924, %v642_v24  }
 0x11c   : > { %p958_p1 = pneg %p957_p13 }
 0x11e   : > { %617 = vrot.lane.b32.xlu1 %v1213_v20, %s1039_s12  ;;  %v533_v20 = vmul.f32 %v531_v13, %v1219_v23 }
 0x122   : > { %569 = vrot.lane.b32.xlu1 %v1219_v23, %s1034_s25 }
 0x126   : > { %594 = vrot.lane.b32.xlu1 %v1219_v23, %s1038_s24  ;;  %s961_s24 = scalar_lea.vmem %s960_s14, 256 }
 0x127   : > { %p963_p5 = scmp.lt.s32.totalorder %s961_s24, %s955_s10 }
 0x129   : > { %p964_p8 = por %p963_p5, %p962_p3 }
 0x12a   : > { %619 = vrot.lane.b32.xlu1 %v1219_v23, %s1039_s12  ;;  %v581_v23 = vrot.slane %v1272_v49, %v576_v19 }
 0x12b   : > { %p965_p10 = pnand %p964_p8, %p958_p1 }
 0x12e   : > { %658 = vperm.xlu1 %925, %v655_v25  }
 0x174   : > { %v475_v34 = vpop.permute.xlu0 %474  ;;  %v422_v35 = vpop.permute.xlu1 %421 }
 0x178   : > { %v1252_v36 = vpop.permute.xlu0 %567  ;;  %v450_v37 = vpop.permute.xlu1 %449 }
 0x17c   : > { %v424_v39 = vpop.permute.xlu0 %423  ;;  %v500_v40 = vpop.permute.xlu1 %499 }
 0x17d   : > { %v428_v59 = vsel %vm427_vm3, %v422_v35, %v424_v39  ;;  %v429_v60 = vsel %vm427_vm3, %v424_v39, %v422_v35 }
 0x17e   : > { %v438_v4 = vmul.f32 %v433_v51, %v429_v60  ;;  %v439_v6 = vmul.f32 %v437_v52, %v428_v59 }
 0x180   : > { %v1260_v45 = vpop.permute.xlu1 %542  ;;  %v452_v47 = vpop.permute.xlu0 %451  ;;  %v445_v21 = vmul.f32 %v443_v27, %v438_v4  ;;  %v446_v22 = vmul.f32 %v443_v27, %v439_v6  ;;  %v556_v27 = vrot.slane %v1272_v49, %v551_v14 }
 0x181   : > { %v454_v56 = vsel %vm453_vm2, %v450_v37, %v452_v47  ;;  %v455_v57 = vsel %vm453_vm2, %v452_v47, %v450_v37 }
 0x182   : > { %v464_v0 = vmul.f32 %v459_v53, %v455_v57  ;;  %v465_v1 = vmul.f32 %v463_v54, %v454_v56  ;;  %v538_v56 = vmul.f32 %v1246_v31, %v532_v15  ;;  %v539_v57 = vmul.f32 %v1246_v31, %v533_v20 }
 0x183   : > { %v606_v31 = vrot.slane %v1272_v49, %v601_v50 }
 0x184   : > { %v1280_v55 = vpop.permute.xlu1 %592  ;;  %v470_v16 = vmul.f32 %v468_v26, %v464_v0  ;;  %v471_v17 = vmul.f32 %v468_v26, %v465_v1  ;;  %v552_v26 = vrot.slane %v1267_v48, %v551_v14  ;;  %v545_v39 = vpop.permute.xlu0 %544  ;;  %v602_v0 = vrot.slane %v1267_v48, %v601_v50 }
 0x185   : > { %v547_v51 = vsel %vm546_vm6, %v1260_v45, %v545_v39  ;;  %v548_v52 = vsel %vm546_vm6, %v545_v39, %v1260_v45 }
 0x186   : > { %v472_v43 = vadd.f32 %v470_v16, %v445_v21  ;;  %v473_v44 = vadd.f32 %v471_v17, %v446_v22  ;;  %v557_v60 = vmul.f32 %v552_v26, %v547_v51 }
 0x188   : > { %v477_v2 = vpop.permute.xlu1 %476  ;;  %v563_v6 = vmul.f32 %v1244_v30, %v557_v60 }
 0x189   : > { %v479_v7 = vsel %vm478_vm4, %v475_v34, %v477_v2  ;;  %v480_v8 = vsel %vm478_vm4, %v477_v2, %v475_v34 }
 0x18a   : > { %v489_v9 = vmul.f32 %v484_v58, %v480_v8  ;;  %v490_v10 = vmul.f32 %v488_v61, %v479_v7  ;;  %v558_v61 = vmul.f32 %v556_v27, %v548_v52 }
 0x18c   : > { %v502_v18 = vpop.permute.xlu1 %501  ;;  %v495_v34 = vmul.f32 %v1240_v28, %v489_v9  ;;  %v496_v35 = vmul.f32 %v1240_v28, %v490_v10  ;;  %v577_v28 = vrot.slane %v1267_v48, %v576_v19  ;;  %v564_v7 = vmul.f32 %v1244_v30, %v558_v61  ;;  %v842_v30 = vld [vmem:[%s1393_s5 + $0x18] ss:$0 sm:$0xff] }
 0x18d   : > { %v504_v24 = vsel %vm503_vm5, %v500_v40, %v502_v18  ;;  %v505_v25 = vsel %vm503_vm5, %v502_v18, %v500_v40 }
 0x18e   : > { %v514_v37 = vmul.f32 %v509_v11, %v505_v25  ;;  %v515_v38 = vmul.f32 %v513_v12, %v504_v24  ;;  %v497_v53 = vadd.f32 %v495_v34, %v472_v43  ;;  %v498_v54 = vadd.f32 %v496_v35, %v473_v44  ;;  %v841_v11 = vld [vmem:[%s1393_s5 + $0x10] ss:$0 sm:$0xff]  ;;  %v654_v44 = vld [vmem:[%s1394_s6] sm:$0xf] }
 0x190   : > { %v520_v46 = vmul.f32 %v1242_v29, %v514_v37  ;;  %v521_v40 = vmul.f32 %v1242_v29, %v515_v38  ;;  %v618_v47 = vpop.permute.xlu1 %617 }
 0x191   : > { %v636_v12 = vpop.permute.xlu0 %635 }
 0x192   : > { %v522_v29 = vadd.f32 %v520_v46, %v497_v53  ;;  %v523_v58 = vadd.f32 %v521_v40, %v498_v54 }
 0x194   : > { %v570_v59 = vpop.permute.xlu1 %569  ;;  %v540_v1 = vadd.f32 %v538_v56, %v522_v29  ;;  %v541_v2 = vadd.f32 %v539_v57, %v523_v58 }
 0x195   : > { %v572_v41 = vsel %vm571_vm7, %v1252_v36, %v570_v59  ;;  %v573_v45 = vsel %vm571_vm7, %v570_v59, %v1252_v36 }
 0x196   : > { %v582_v62 = vmul.f32 %v577_v28, %v572_v41  ;;  %v583_v63 = vmul.f32 %v581_v23, %v573_v45  ;;  %v565_v15 = vadd.f32 %v563_v6, %v540_v1  ;;  %v566_v16 = vadd.f32 %v564_v7, %v541_v2  ;;  %v646_v37 = vpop.permute.xlu0 %645 }
 0x198   : > { %v595_v4 = vpop.permute.xlu1 %594  ;;  %v588_v48 = vmul.f32 %v1248_v32, %v582_v62  ;;  %v589_v49 = vmul.f32 %v1248_v32, %v583_v63 }
 0x199   : > { %v597_v8 = vsel %vm596_vm8, %v1280_v55, %v595_v4  ;;  %v598_v36 = vsel %vm596_vm8, %v595_v4, %v1280_v55 }
 0x19a   : > { %v607_v9 = vmul.f32 %v602_v0, %v597_v8  ;;  %v608_v10 = vmul.f32 %v606_v31, %v598_v36  ;;  %v590_v21 = vadd.f32 %v588_v48, %v565_v15  ;;  %v591_v22 = vadd.f32 %v589_v49, %v566_v16 }
 0x19c   : > { %v613_v13 = vmul.f32 %v1250_v33, %v607_v9  ;;  %v614_v14 = vmul.f32 %v1250_v33, %v608_v10  ;;  %v620_v55 = vpop.permute.xlu1 %619 }
 0x19d   : > { %v622_v32 = vsel %vm621_vm9, %v618_v47, %v620_v55  ;;  %v623_v17 = vsel %vm621_vm9, %v620_v55, %v618_v47 }
 0x19e   : > { %v632_v18 = vmul.f32 %v841_v11, %v622_v32  ;;  %v633_v19 = vmul.f32 %v842_v30, %v623_v17  ;;  %v615_v34 = vadd.f32 %v613_v13, %v590_v21  ;;  %v616_v35 = vadd.f32 %v614_v14, %v591_v22 }
 0x1a0   : > { %v638_v24 = vmul.f32 %v636_v12, %v632_v18  ;;  %v639_v25 = vmul.f32 %v636_v12, %v633_v19 }
 0x1a2   : > { %v640_v38 = vadd.f32 %v638_v24, %v615_v34  ;;  %v641_v33 = vadd.f32 %v639_v25, %v616_v35 }
 0x1a4   : > { %v648_v20 = vadd.f32 %v646_v37, %v640_v38  ;;  %v649_v26 = vadd.f32 %v646_v37, %v641_v33 }
 0x1a6   : > { %v650_v27 = vmax.f32 %v648_v20, 0.0  ;;  %v651_v39 = vmax.f32 %v649_v26, 0.0 }
 0x1a8   : > { %v653_v43 = vmin.f32 %v651_v39, 6.0  ;;  %v652_v42 = vmin.f32 %v650_v27, 6.0 }
 0x1a9   : > { %v659_v46 = vpop.permute.xlu1 %658 }
 0x1aa   : > { %695 = vmatprep.subr.mxu1 %v653_v43 }
 0x1ab   : > { %696 = vmatpush1.msra.mxu1 %v652_v42 }
 0x1ac   : > { %843 = vmatmul.mubr.msk.f32.vlgmr.msra.gmra.mxu1 %vm661_vm10, %v654_v44 }
 0x26c   : > { %v731_v40 = vpop.f32.mrf.mxu1 }
 0x26d   : > { %v732_v47 = vadd.f32 %v731_v40, %v659_v46 }
 0x26e   : > { %v733_v28 = vpop.f32.mrf.mxu1 }
 0x26f   : > { %v734_v23 = vadd.f32 %v733_v28, %v659_v46  ;;  %v737_v50 = vadd.f32 %v732_v47, %v1195_v3 }
 0x271   : > { %v738_v51 = vadd.f32 %v734_v23, %v1202_v5 }
 0x273   : > { %v741_v52 = vcombine.low %v737_v50, %v738_v51 }
 0x275   : > { %743 = vst [vmem:[%s321_s22] sm:$0xff] %v741_v52 }
 0x276   : > { %968 = shalt.err (!%p965_p10)
}
 0x277   : > { %s969_s26 = scalar_lea.hbm %s757_s20, 128  ;;  %s973_s12 = scalar_lea.hbm %s1396_s8, 256 }
 0x278   : > { %p970_p2 = scmp.ne.s32.totalorder %s757_s20, %s969_s26  ;;  %p974_p7 = scmp.lt.s32.totalorder %s757_s20, %s1396_s8 }
 0x279   : > { %p975_p0 = scmp.lt.s32.totalorder %s973_s12, %s969_s26 }
 0x27a   : > { %p971_p4 = pnand %p970_p2, %p1408_p12 }
 0x27b   : > { %p976_p6 = por %p975_p0, %p974_p7 }
 0x27c   : > { %p972_p9 = pneg %p971_p4 }
 0x27e   : > { %p977_p11 = pnand %p976_p6, %p972_p9 }
 0x280   : > { %980 = shalt.err (!%p977_p11)
}
 0x281   : > { %853 = dma.vmem_to_hbm [thread:$0]  (%p1408_p12), %s760_s23, 128, %s757_s20, %s745_s21  }
 0x282 PF: > { %s771_s19 = sand.u32 1, %s1007_s27   ;;  %p1409_p13 = scmp.ne.s32.totalorder %s1403_s18, 0 }
 0x283   : > { %p1410_p1 = scmp.ge.s32.totalorder %s1019_s30, 2  ;;  %s772_s25 = scalar_lea.sflag [#allocation4], %s771_s19 }
 0x285   : > { %p860_p3 = pnand %p1410_p1, %p1409_p13 }
 0x287   : > { %p861_p5 = pneg %p860_p3 }
 0x289   : > { %1002 = dma.done.wait (%p861_p5), %s772_s25, 128  }
 0x28a   : > { %1004 = vsyncadd (%p861_p5), %s772_s25, 4294967168  ;;  %s1411_s10 = sld [smem:[#allocation8_spill]]  ;;  %p21_p8 = scmp.ge.s32.totalorder %s1111_s11, 4  }
 0x28b   : > { %s1412_s27 = smov %s1011_s28  ;;  %s1413_s28 = smov %s1015_s29 }
 0x28c   : > { %s1415_s30 = smov %s1111_s11  ;;  %23 = sbr.rel (!%p21_p8) target bundleno = 5 (0x5), region = 97 }
 0x290   : > { %s1414_s29 = smov %s1411_s10 }
 0x291   :  { %777 = vsyncpa [#allocation3], 1 }
 0x292   :  { %779 = vsyncpa [#allocation3 + $0x1], 1 }
 0x293   :  { %780 = vsyncpa [#allocation4], 1 }
 0x294   :  { %782 = vsyncpa [#allocation4 + $0x1], 1 }

</bundles_post_ra>
